<compile_context>
chip_gen: v7x
topology: tpu7x:2x2x1
jax: 0.10.0
libtpu: 0.0.40
codegen_flags: <defaults>
</compile_context>

<pallas_src>
import functools

import jax
import jax.numpy as jnp
from jax.experimental import pallas as pl
from jax.experimental.pallas import tpu as pltpu


def _cdiv(a, b):
    return -(-a // b)


def _round_up(a, b):
    return b * _cdiv(a, b)


# ----------------------------------------------------------------------------
# Pallas kernel: fused block-diagonal complex 2-layer MLP + ReLU + softshrink
# ----------------------------------------------------------------------------
def _afno_mlp_kernel(xr_ref, xi_ref, w1a_ref, w1b_ref, b1_ref, w2_ref, b2_ref,
                     o_ref, *, lam, compute_dtype):
    # Layer 1 (complex-as-real, all blocks at once):
    #   [o1r | o1i] = relu( xr @ [Wr|Wi] + xi @ [-Wi|Wr] + [b1r|b1i] )
    h = (jnp.dot(xr_ref[...], w1a_ref[...], preferred_element_type=jnp.float32)
         + jnp.dot(xi_ref[...], w1b_ref[...], preferred_element_type=jnp.float32)
         + b1_ref[...])
    h = jnp.maximum(h, 0.0)                                    # f32 ReLU
    if jnp.dtype(compute_dtype) != jnp.dtype(jnp.float32):
        h = h.astype(compute_dtype)                            # bf16 operands, f32 acc
    # Layer 2: [o2r | o2i | 0pad] = h @ W2p + b2p   (output cols padded to 128-dense)
    o = jnp.dot(h, w2_ref[...], preferred_element_type=jnp.float32) + b2_ref[...]
    # softshrink(o, lam) in f32; padded cols are exactly 0 and stay 0.
    o_ref[...] = jnp.where(o > lam, o - lam,
                           jnp.where(o < -lam, o + lam, 0.0))


def afno_packed_mlp(xr, xi, pw, lam, *, compute_dtype=jnp.float32,
                    max_tm=512, target_tiles=8):
    """xr, xi: [M, C].  Returns softshrunk packed [o2r | o2i | 0pad], shape [M, Np] f32."""
    M, C = xr.shape
    HD2 = pw["w1a"].shape[1]        # 2 * C * hidden_size_factor
    Np = pw["w2"].shape[1]          # 2C rounded up to a multiple of 128 (lane-dense)

    # Row tile: multiple of 16 (bf16 sublane packing), aiming for >= 4-8 grid steps so a
    # v7x megacore still gets >= 2 steps per TensorCore (per-core double buffering),
    # capped so double-buffered tiles + resident weights stay well inside VMEM.
    tm = max(16, min(max_tm, _round_up(_cdiv(M, target_tiles), 16)))
    n_tiles = _cdiv(M, tm)
    Mp = n_tiles * tm
    if Mp != M:
        # Padded rows run through the biases and produce nonzero junk; sliced off below.
        xr = jnp.pad(xr, ((0, Mp - M), (0, 0)))
        xi = jnp.pad(xi, ((0, Mp - M), (0, 0)))

    # Explicit VMEM budget (v5e default scoped limit is only 16 MiB; v7x physical 64).
    a_it = jnp.dtype(compute_dtype).itemsize
    w_bytes = (2 * C * HD2 + HD2 * Np) * a_it + (HD2 + Np) * 4
    tile_bytes = 2 * (2 * tm * C * a_it) + 2 * (tm * Np * 4)     # double-buffered io
    scratch_bytes = 3 * tm * HD2 * 4                             # f32 intermediates
    vmem_limit = int(min(64 << 20,
                         max(16 << 20, 2 * (w_bytes + tile_bytes + scratch_bytes))))

    out = pl.pallas_call(
        functools.partial(_afno_mlp_kernel, lam=lam, compute_dtype=compute_dtype),
        out_shape=jax.ShapeDtypeStruct((Mp, Np), jnp.float32),
        grid=(n_tiles,),
        in_specs=[
            pl.BlockSpec((tm, C), lambda m: (m, 0)),        # xr row tiles
            pl.BlockSpec((tm, C), lambda m: (m, 0)),        # xi row tiles
            pl.BlockSpec((C, HD2), lambda m: (0, 0)),       # weights/biases are
            pl.BlockSpec((C, HD2), lambda m: (0, 0)),       #  grid-invariant -> fetched
            pl.BlockSpec((1, HD2), lambda m: (0, 0)),       #  once, resident in VMEM
            pl.BlockSpec((HD2, Np), lambda m: (0, 0)),
            pl.BlockSpec((1, Np), lambda m: (0, 0)),
        ],
        out_specs=pl.BlockSpec((tm, Np), lambda m: (m, 0)),  # lane-dense: Np % 128 == 0
        compiler_params=pltpu.CompilerParams(
            dimension_semantics=("parallel",),
            vmem_limit_bytes=vmem_limit),
    )(xr, xi, pw["w1a"], pw["w1b"], pw["b1"], pw["w2"], pw["b2"])

    return out[:M] if Mp != M else out


# ----------------------------------------------------------------------------
# One-time weight packing (hoisted out of the per-step forward)
# ----------------------------------------------------------------------------
def _block_diag(w):
    """[nb, r, c] -> block-diagonal [nb*r, nb*c]."""
    nb, r, c = w.shape
    eye = jnp.eye(nb, dtype=w.dtype)
    return (eye[:, None, :, None] * w[:, :, None, :]).reshape(nb * r, nb * c)


def prepare_afno_params(params, *, compute_dtype=jnp.float32):
    """Pack per-block complex weights into complex-as-real block-diagonal matrices.

      w1a = [Wr | Wi]   ([C, 2HD]),   w1b = [-Wi | Wr]   ([C, 2HD])
      w2  = [[Vr, Vi], [-Vi, Vr]]     ([2HD, 2C]) zero-padded to Np = roundup(2C, 128)

    so each MLP layer becomes a single lane-dense real matmul over all blocks, and the
    kernel output is already 128-lane dense.  Call once; do NOT call inside the jitted
    per-step forward.
    """
    w1, b1, w2, b2 = params["w1"], params["b1"], params["w2"], params["b2"]
    Wr, Wi = _block_diag(w1[0]), _block_diag(w1[1])          # [C, HD]
    Vr, Vi = _block_diag(w2[0]), _block_diag(w2[1])          # [HD, C]
    w1a = jnp.concatenate([Wr, Wi], axis=1)                  # [C, 2HD]
    w1b = jnp.concatenate([-Wi, Wr], axis=1)                 # [C, 2HD]
    b1p = jnp.concatenate([b1[0].reshape(1, -1), b1[1].reshape(1, -1)], axis=1)
    w2p = jnp.concatenate(
        [jnp.concatenate([Vr, Vi], axis=1),
         jnp.concatenate([-Vi, Vr], axis=1)], axis=0)        # [2HD, 2C]
    b2p = jnp.concatenate([b2[0].reshape(1, -1), b2[1].reshape(1, -1)], axis=1)

    C2 = w2p.shape[1]
    Np = _round_up(C2, 128)          # lane-dense kernel output (unmasked stores)
    if Np != C2:
        w2p = jnp.pad(w2p, ((0, 0), (0, Np - C2)))
        b2p = jnp.pad(b2p, ((0, 0), (0, Np - C2)))

    if jnp.dtype(compute_dtype) != jnp.dtype(jnp.float32):
        w1a = w1a.astype(compute_dtype)
        w1b = w1b.astype(compute_dtype)
        w2p = w2p.astype(compute_dtype)
    # Biases stay f32: bias add / ReLU / softshrink are f32 on every generation.
    return {"w1a": w1a, "w1b": w1b, "b1": b1p, "w2": w2p, "b2": b2p}


# ----------------------------------------------------------------------------
# Full AFNO2D forward (FFT glue in plain JAX, fused MLP hot path in Pallas)
# ----------------------------------------------------------------------------
def afno2d_forward(x, packed, *, sparsity_threshold, hard_thresholding_fraction,
                   compute_dtype=jnp.float32):
    bias = x
    dtype = x.dtype
    B, C, H, W = x.shape

    xf = x.astype(jnp.float32).reshape(B, H, W, C)   # torch does a reshape (view), not a permute
    # TODO(synk): FFT/IFFT have no Pallas TPU primitive; computed with jnp.fft.
    # rfft2 == fft2(real input)[:, :, :W//2+1]; torch's irfft2(s=(H, W)) only consumes
    # those columns, so working on the half spectrum is exactly equivalent and ~2x cheaper.
    Wh = W // 2 + 1
    xc = jnp.fft.rfft2(xf, axes=(1, 2), norm='ortho')          # [B, H, Wh, C]

    total_modes = H * W // 2 + 1
    kept = int(total_modes * hard_thresholding_fraction)
    kept = max(0, min(kept, Wh))     # modes past Wh are dropped by irfft2 in torch anyway
    if kept == 0:
        return bias                  # spectrum fully masked -> irfft2(0) == 0

    xk = xc[:, :, :kept, :]                                    # [B, H, kept, C]
    M = B * H * kept
    # Two un-packed activations; extraction + optional bf16 cast fuse into one producer
    # each.  No [M, 2C] concat / column-pad round trip through HBM.
    xr = jnp.real(xk).reshape(M, C)
    xi = jnp.imag(xk).reshape(M, C)
    if jnp.dtype(compute_dtype) != jnp.dtype(jnp.float32):
        xr = xr.astype(compute_dtype)
        xi = xi.astype(compute_dtype)

    op = afno_packed_mlp(xr, xi, packed, sparsity_threshold,
                         compute_dtype=compute_dtype)          # [M, Np] f32
    ok = jax.lax.complex(op[:, :C], op[:, C:2 * C]).reshape(B, H, kept, C)
    spec = jnp.pad(ok, ((0, 0), (0, 0), (0, Wh - kept), (0, 0)))   # zero masked modes
    y = jnp.fft.irfft2(spec, s=(H, W), axes=(1, 2), norm='ortho')  # [B, H, W, C] real
    y = y.reshape(B, C, H, W).astype(dtype)                    # torch reshape, not permute
    return y + bias


# ----------------------------------------------------------------------------
# Pure-JAX reference: literal transcription of the PyTorch forward
# ----------------------------------------------------------------------------
def _softshrink(v, lam):
    return jnp.where(v > lam, v - lam, jnp.where(v < -lam, v + lam, 0.0))


def _ref_forward(x, params, *, num_blocks, hidden_size_factor,
                 sparsity_threshold, hard_thresholding_fraction):
    del hidden_size_factor
    bias = x
    dtype = x.dtype
    B, C, H, W = x.shape
    nb = num_blocks
    bs = C // nb
    w1, b1, w2, b2 = params["w1"], params["b1"], params["w2"], params["b2"]

    xf = x.astype(jnp.float32).reshape(B, H, W, C)
    xc = jnp.fft.fft2(xf, axes=(1, 2), norm='ortho').reshape(B, H, W, nb, bs)
    total_modes = H * W // 2 + 1
    kept = int(total_modes * hard_thresholding_fraction)

    xk = xc[:, :, :kept]
    o1r = jax.nn.relu(jnp.einsum('...bi,bio->...bo', xk.real, w1[0])
                      - jnp.einsum('...bi,bio->...bo', xk.imag, w1[1]) + b1[0])
    o1i = jax.nn.relu(jnp.einsum('...bi,bio->...bo', xk.imag, w1[0])
                      + jnp.einsum('...bi,bio->...bo', xk.real, w1[1]) + b1[1])
    o2r = (jnp.einsum('...bi,bio->...bo', o1r, w2[0])
           - jnp.einsum('...bi,bio->...bo', o1i, w2[1]) + b2[0])
    o2i = (jnp.einsum('...bi,bio->...bo', o1i, w2[0])
           + jnp.einsum('...bi,bio->...bo', o1r, w2[1]) + b2[1])

    fr = jnp.zeros(xc.shape, jnp.float32).at[:, :, :kept].set(o2r)
    fi = jnp.zeros(xc.shape, jnp.float32).at[:, :, :kept].set(o2i)
    fr = _softshrink(fr, sparsity_threshold)
    fi = _softshrink(fi, sparsity_threshold)
    spec = (fr + 1j * fi).reshape(B, H, W, C)
    spec = spec[:, :, :W // 2 + 1, :]   # torch irfft2(s=(H, W)) trims dim 2 to W//2+1
    y = jnp.fft.irfft2(spec, s=(H, W), axes=(1, 2), norm='ortho')
    y = y.reshape(B, C, H, W).astype(dtype)
    return y + bias


# ----------------------------------------------------------------------------
# Main
# ----------------------------------------------------------------------------
if __name__ == "__main__":
    B, H, W = 2, 16, 16
    hidden_size = 32
    num_blocks = 4
    block_size = hidden_size // num_blocks
    hidden_size_factor = 2
    sparsity_threshold = 0.01
    hard_thresholding_fraction = 0.1
    scale = 0.02

    key = jax.random.PRNGKey(0)
    kx, k1, k2, k3, k4 = jax.random.split(key, 5)

    x = jax.random.normal(kx, (B, hidden_size, H, W), dtype=jnp.float32)
    params = {
        "w1": scale * jax.random.normal(
            k1, (2, num_blocks, block_size, block_size * hidden_size_factor),
            dtype=jnp.float32),
        "b1": scale * jax.random.normal(
            k2, (2, num_blocks, block_size * hidden_size_factor), dtype=jnp.float32),
        "w2": scale * jax.random.normal(
            k3, (2, num_blocks, block_size * hidden_size_factor, block_size),
            dtype=jnp.float32),
        "b2": scale * jax.random.normal(
            k4, (2, num_blocks, block_size), dtype=jnp.float32),
    }

    # One-time weight packing (hoisted out of the per-step forward).
    packed_f32 = prepare_afno_params(params, compute_dtype=jnp.float32)

    fwd = jax.jit(functools.partial(
        afno2d_forward,
        sparsity_threshold=sparsity_threshold,
        hard_thresholding_fraction=hard_thresholding_fraction,
        compute_dtype=jnp.float32))

    out = fwd(x, packed_f32)
    jax.block_until_ready(out)
    assert out.shape == (B, hidden_size, H, W)
    assert out.dtype == x.dtype

    # Correctness: compare against a literal pure-JAX transcription of the torch forward.
    ref = _ref_forward(x, params,
                       num_blocks=num_blocks,
                       hidden_size_factor=hidden_size_factor,
                       sparsity_threshold=sparsity_threshold,
                       hard_thresholding_fraction=hard_thresholding_fraction)
    max_err = float(jnp.max(jnp.abs(out - ref)))
    assert jnp.allclose(out, ref, atol=1e-4, rtol=1e-4), max_err

    # bf16-operand fast path (usable on v5e/v6e/v7x): f32 accumulation and f32
    # bias/ReLU/softshrink, bf16 matmul operands + halved weight/activation DMA bytes.
    packed_bf16 = prepare_afno_params(params, compute_dtype=jnp.bfloat16)
    fwd_bf16 = jax.jit(functools.partial(
        afno2d_forward,
        sparsity_threshold=sparsity_threshold,
        hard_thresholding_fraction=hard_thresholding_fraction,
        compute_dtype=jnp.bfloat16))
    out_bf16 = fwd_bf16(x, packed_bf16)
    jax.block_until_ready(out_bf16)
    assert out_bf16.shape == out.shape
    assert float(jnp.max(jnp.abs(out_bf16 - ref))) < 5e-2   # loose: bf16 dot operands

    print("KERNEL_OK")
</pallas_src>

<mosaic_0001>
module attributes {stable_mosaic.version = 11 : i64} {
  func.func @_afno_mlp_kernel(%arg0: i32, %arg1: memref<48x32xf32, #tpu.memory_space<vmem>>, %arg2: memref<48x32xf32, #tpu.memory_space<vmem>>, %arg3: memref<32x128xf32, #tpu.memory_space<vmem>>, %arg4: memref<32x128xf32, #tpu.memory_space<vmem>>, %arg5: memref<1x128xf32, #tpu.memory_space<vmem>>, %arg6: memref<128x128xf32, #tpu.memory_space<vmem>>, %arg7: memref<1x128xf32, #tpu.memory_space<vmem>>, %arg8: memref<48x128xf32, #tpu.memory_space<vmem>>) attributes {dimension_semantics = [#tpu.dimension_semantics<parallel>], iteration_bounds = array<i64: 6>, scalar_prefetch = 0 : i64, scratch_operands = 0 : i64, tpu.core_type = #tpu.core_type<tc>, window_params = [{transform_indices = @transform_0, window_bounds = array<i64: 48, 32>}, {transform_indices = @transform_1, window_bounds = array<i64: 48, 32>}, {pipeline_mode = #tpu.pipeline_mode<synchronous>, transform_indices = @transform_2, window_bounds = array<i64: 32, 128>}, {pipeline_mode = #tpu.pipeline_mode<synchronous>, transform_indices = @transform_3, window_bounds = array<i64: 32, 128>}, {pipeline_mode = #tpu.pipeline_mode<synchronous>, transform_indices = @transform_4, window_bounds = array<i64: 1, 128>}, {pipeline_mode = #tpu.pipeline_mode<synchronous>, transform_indices = @transform_5, window_bounds = array<i64: 128, 128>}, {pipeline_mode = #tpu.pipeline_mode<synchronous>, transform_indices = @transform_6, window_bounds = array<i64: 1, 128>}, {transform_indices = @transform_7, window_bounds = array<i64: 48, 128>}]} {
    %c0 = arith.constant 0 : index
    %c0_0 = arith.constant 0 : index
    %0 = vector.load %arg1[%c0, %c0_0] : memref<48x32xf32, #tpu.memory_space<vmem>>, vector<48x32xf32>
    %c0_1 = arith.constant 0 : index
    %c0_2 = arith.constant 0 : index
    %1 = vector.load %arg3[%c0_1, %c0_2] : memref<32x128xf32, #tpu.memory_space<vmem>>, vector<32x128xf32>
    %cst = arith.constant dense<0.000000e+00> : vector<48x128xf32>
    %2 = tpu.matmul %0, %1, %cst {dimension_numbers = #tpu.dot_dimension_numbers<[1], [0], [0], [1], [0, 0, 1, 1], [], []>} : vector<48x32xf32>, vector<32x128xf32>, vector<48x128xf32> -> vector<48x128xf32>
    %c0_3 = arith.constant 0 : index
    %c0_4 = arith.constant 0 : index
    %3 = vector.load %arg2[%c0_3, %c0_4] : memref<48x32xf32, #tpu.memory_space<vmem>>, vector<48x32xf32>
    %c0_5 = arith.constant 0 : index
    %c0_6 = arith.constant 0 : index
    %4 = vector.load %arg4[%c0_5, %c0_6] : memref<32x128xf32, #tpu.memory_space<vmem>>, vector<32x128xf32>
    %cst_7 = arith.constant dense<0.000000e+00> : vector<48x128xf32>
    %5 = tpu.matmul %3, %4, %cst_7 {dimension_numbers = #tpu.dot_dimension_numbers<[1], [0], [0], [1], [0, 0, 1, 1], [], []>} : vector<48x32xf32>, vector<32x128xf32>, vector<48x128xf32> -> vector<48x128xf32>
    %6 = arith.addf %2, %5 : vector<48x128xf32>
    %c0_8 = arith.constant 0 : index
    %c0_9 = arith.constant 0 : index
    %7 = vector.load %arg5[%c0_8, %c0_9] : memref<1x128xf32, #tpu.memory_space<vmem>>, vector<1x128xf32>
    %8 = vector.broadcast %7 : vector<1x128xf32> to vector<48x128xf32>
    %9 = arith.addf %6, %8 : vector<48x128xf32>
    %cst_10 = arith.constant 0.000000e+00 : f32
    %10 = vector.broadcast %cst_10 : f32 to vector<48x128xf32>
    %11 = arith.maximumf %9, %10 : vector<48x128xf32>
    %c0_11 = arith.constant 0 : index
    %c0_12 = arith.constant 0 : index
    %12 = vector.load %arg6[%c0_11, %c0_12] : memref<128x128xf32, #tpu.memory_space<vmem>>, vector<128x128xf32>
    %cst_13 = arith.constant dense<0.000000e+00> : vector<48x128xf32>
    %13 = tpu.matmul %11, %12, %cst_13 {dimension_numbers = #tpu.dot_dimension_numbers<[1], [0], [0], [1], [0, 0, 1, 1], [], []>} : vector<48x128xf32>, vector<128x128xf32>, vector<48x128xf32> -> vector<48x128xf32>
    %c0_14 = arith.constant 0 : index
    %c0_15 = arith.constant 0 : index
    %14 = vector.load %arg7[%c0_14, %c0_15] : memref<1x128xf32, #tpu.memory_space<vmem>>, vector<1x128xf32>
    %15 = vector.broadcast %14 : vector<1x128xf32> to vector<48x128xf32>
    %16 = arith.addf %13, %15 : vector<48x128xf32>
    %cst_16 = arith.constant 0.00999999977 : f32
    %17 = vector.broadcast %cst_16 : f32 to vector<48x128xf32>
    %18 = arith.cmpf ogt, %16, %17 : vector<48x128xf32>
    %cst_17 = arith.constant 0.00999999977 : f32
    %19 = vector.broadcast %cst_17 : f32 to vector<48x128xf32>
    %20 = arith.subf %16, %19 : vector<48x128xf32>
    %cst_18 = arith.constant -0.00999999977 : f32
    %21 = vector.broadcast %cst_18 : f32 to vector<48x128xf32>
    %22 = arith.cmpf olt, %16, %21 : vector<48x128xf32>
    %cst_19 = arith.constant 0.00999999977 : f32
    %23 = vector.broadcast %cst_19 : f32 to vector<48x128xf32>
    %24 = arith.addf %16, %23 : vector<48x128xf32>
    %cst_20 = arith.constant 0.000000e+00 : f32
    %25 = vector.broadcast %cst_20 : f32 to vector<48x128xf32>
    %26 = arith.select %22, %24, %25 : vector<48x128xi1>, vector<48x128xf32>
    %27 = arith.select %18, %20, %26 : vector<48x128xi1>, vector<48x128xf32>
    %c0_21 = arith.constant 0 : index
    %c0_22 = arith.constant 0 : index
    %28 = vector.load %arg8[%c0_21, %c0_22] : memref<48x128xf32, #tpu.memory_space<vmem>>, vector<48x128xf32>
    tpu.vector_store %arg8[%c0_21, %c0_22], %27 {strides = array<i32>} : memref<48x128xf32, #tpu.memory_space<vmem>>, vector<48x128xf32>,
    return
  }
  func.func @transform_0(%arg0: i32) -> (i32, i32) {
    %c0_i32 = arith.constant 0 : i32
    %c0_i32_0 = arith.constant 0 : i32
    return %arg0, %c0_i32 : i32, i32
  }
  func.func @transform_1(%arg0: i32) -> (i32, i32) {
    %c0_i32 = arith.constant 0 : i32
    %c0_i32_0 = arith.constant 0 : i32
    return %arg0, %c0_i32 : i32, i32
  }
  func.func @transform_2(%arg0: i32) -> (i32, i32) {
    %c0_i32 = arith.constant 0 : i32
    %c0_i32_0 = arith.constant 0 : i32
    %c0_i32_1 = arith.constant 0 : i32
    return %c0_i32, %c0_i32_0 : i32, i32
  }
  func.func @transform_3(%arg0: i32) -> (i32, i32) {
    %c0_i32 = arith.constant 0 : i32
    %c0_i32_0 = arith.constant 0 : i32
    %c0_i32_1 = arith.constant 0 : i32
    return %c0_i32, %c0_i32_0 : i32, i32
  }
  func.func @transform_4(%arg0: i32) -> (i32, i32) {
    %c0_i32 = arith.constant 0 : i32
    %c0_i32_0 = arith.constant 0 : i32
    %c0_i32_1 = arith.constant 0 : i32
    return %c0_i32, %c0_i32_0 : i32, i32
  }
  func.func @transform_5(%arg0: i32) -> (i32, i32) {
    %c0_i32 = arith.constant 0 : i32
    %c0_i32_0 = arith.constant 0 : i32
    %c0_i32_1 = arith.constant 0 : i32
    return %c0_i32, %c0_i32_0 : i32, i32
  }
  func.func @transform_6(%arg0: i32) -> (i32, i32) {
    %c0_i32 = arith.constant 0 : i32
    %c0_i32_0 = arith.constant 0 : i32
    %c0_i32_1 = arith.constant 0 : i32
    return %c0_i32, %c0_i32_0 : i32, i32
  }
  func.func @transform_7(%arg0: i32) -> (i32, i32) {
    %c0_i32 = arith.constant 0 : i32
    %c0_i32_0 = arith.constant 0 : i32
    return %arg0, %c0_i32 : i32, i32
  }
}

</mosaic_0001>

<bundles_post_ra>
// kernel: reverse.1
= control target key start
LH: loop header
LB: loop body
LE: loop exit
PB: predicated region body
PF: predicated region fallthrough
CT: control target
= control target key end

     0   :  { %s344_s0 = inlined_call_operand.vmem [shape: f32[2,32,16,7], index: 0, kind: input, shape index: {}]   ;;  %s345_s1 = inlined_call_operand.vmem [shape: f32[2,32,16,7], index: 1, kind: output, shape index: {}]  }
   0x1   :  { %v112_v0 = vld [vmem:[%s344_s0 + $0x60] sm:$0xff]  ;;  %v113_v1 = vld [vmem:[%s344_s0 + $0xd0] sm:$0xff]  ;;  %v138_v14 = vld [vmem:[%s344_s0 + $0x68] sm:$0xff] }
   0x2   :  { %v115_v2 = vld [vmem:[%s344_s0 + $0x50] sm:$0xff]  ;;  %4 = vst [vmem:[%s345_s1] sm:$0xff] %v112_v0  ;;  %114 = vst [vmem:[%s345_s1 + $0x70] sm:$0xff] %v113_v1  ;;  %v117_v3 = vld [vmem:[%s344_s0 + $0xc0] sm:$0xff] }
   0x3   :  { %116 = vst [vmem:[%s345_s1 + $0x10] sm:$0xff] %v115_v2  ;;  %v119_v4 = vld [vmem:[%s344_s0 + $0x40] sm:$0xff]  ;;  %v121_v5 = vld [vmem:[%s344_s0 + $0xb0] sm:$0xff]  ;;  %118 = vst [vmem:[%s345_s1 + $0x80] sm:$0xff] %v117_v3 }
   0x4   :  { %120 = vst [vmem:[%s345_s1 + $0x20] sm:$0xff] %v119_v4  ;;  %122 = vst [vmem:[%s345_s1 + $0x90] sm:$0xff] %v121_v5  ;;  %v123_v6 = vld [vmem:[%s344_s0 + $0x30] sm:$0xff]  ;;  %v125_v7 = vld [vmem:[%s344_s0 + $0xa0] sm:$0xff] }
   0x5   :  { %v127_v8 = vld [vmem:[%s344_s0 + $0x20] sm:$0xff]  ;;  %124 = vst [vmem:[%s345_s1 + $0x30] sm:$0xff] %v123_v6  ;;  %126 = vst [vmem:[%s345_s1 + $0xa0] sm:$0xff] %v125_v7  ;;  %v129_v9 = vld [vmem:[%s344_s0 + $0x90] sm:$0xff] }
   0x6   :  { %128 = vst [vmem:[%s345_s1 + $0x40] sm:$0xff] %v127_v8  ;;  %v131_v10 = vld [vmem:[%s344_s0 + $0x10] sm:$0xff]  ;;  %v133_v11 = vld [vmem:[%s344_s0 + $0x80] sm:$0xff]  ;;  %130 = vst [vmem:[%s345_s1 + $0xb0] sm:$0xff] %v129_v9 }
   0x7   :  { %132 = vst [vmem:[%s345_s1 + $0x50] sm:$0xff] %v131_v10  ;;  %134 = vst [vmem:[%s345_s1 + $0xc0] sm:$0xff] %v133_v11  ;;  %v49_v12 = vld [vmem:[%s344_s0] sm:$0xff]  ;;  %v136_v13 = vld [vmem:[%s344_s0 + $0x70] sm:$0xff] }
   0x8   :  { %135 = vst [vmem:[%s345_s1 + $0x60] sm:$0xff] %v49_v12  ;;  %137 = vst [vmem:[%s345_s1 + $0xd0] sm:$0xff] %v136_v13  ;;  %v140_v15 = vld [vmem:[%s344_s0 + $0xd8] sm:$0xff]  ;;  %v144_v17 = vld [vmem:[%s344_s0 + $0xc8] sm:$0xff] }
   0x9   :  { %139 = vst [vmem:[%s345_s1 + $0x8] sm:$0xff] %v138_v14  ;;  %v142_v16 = vld [vmem:[%s344_s0 + $0x58] sm:$0xff]  ;;  %141 = vst [vmem:[%s345_s1 + $0x78] sm:$0xff] %v140_v15  ;;  %v146_v18 = vld [vmem:[%s344_s0 + $0x48] sm:$0xff] }
   0xa   :  { %143 = vst [vmem:[%s345_s1 + $0x18] sm:$0xff] %v142_v16  ;;  %145 = vst [vmem:[%s345_s1 + $0x88] sm:$0xff] %v144_v17  ;;  %v148_v19 = vld [vmem:[%s344_s0 + $0xb8] sm:$0xff]  ;;  %v152_v21 = vld [vmem:[%s344_s0 + $0xa8] sm:$0xff] }
   0xb   :  { %v150_v20 = vld [vmem:[%s344_s0 + $0x38] sm:$0xff]  ;;  %147 = vst [vmem:[%s345_s1 + $0x28] sm:$0xff] %v146_v18  ;;  %149 = vst [vmem:[%s345_s1 + $0x98] sm:$0xff] %v148_v19  ;;  %v154_v22 = vld [vmem:[%s344_s0 + $0x28] sm:$0xff] }
   0xc   :  { %151 = vst [vmem:[%s345_s1 + $0x38] sm:$0xff] %v150_v20  ;;  %v156_v23 = vld [vmem:[%s344_s0 + $0x98] sm:$0xff]  ;;  %153 = vst [vmem:[%s345_s1 + $0xa8] sm:$0xff] %v152_v21  ;;  %v160_v25 = vld [vmem:[%s344_s0 + $0x88] sm:$0xff] }
   0xd   :  { %155 = vst [vmem:[%s345_s1 + $0x48] sm:$0xff] %v154_v22  ;;  %157 = vst [vmem:[%s345_s1 + $0xb8] sm:$0xff] %v156_v23  ;;  %v158_v24 = vld [vmem:[%s344_s0 + $0x18] sm:$0xff]  ;;  %v162_v26 = vld [vmem:[%s344_s0 + $0x8] sm:$0xff] }
   0xe   :  { %159 = vst [vmem:[%s345_s1 + $0x58] sm:$0xff] %v158_v24  ;;  %161 = vst [vmem:[%s345_s1 + $0xc8] sm:$0xff] %v160_v25  ;;  %v164_v27 = vld [vmem:[%s344_s0 + $0x78] sm:$0xff] }
   0xf   :  { %163 = vst [vmem:[%s345_s1 + $0x68] sm:$0xff] %v162_v26  ;;  %165 = vst [vmem:[%s345_s1 + $0xd8] sm:$0xff] %v164_v27 }

// kernel: afno2d_forward.1
= control target key start
LH: loop header
LB: loop body
LE: loop exit
PB: predicated region body
PF: predicated region fallthrough
CT: control target
= control target key end

     0   :  { %s1055_s24 = smov 0   ;;  %s1178_s0 = inlined_call_operand.vmem [shape: f32[288,32], index: 0, kind: input, shape index: {}]   ;;  %s1179_s1 = inlined_call_operand.vmem [shape: f32[288,32], index: 1, kind: input, shape index: {}]   ;;  %s1180_s2 = inlined_call_operand.vmem [shape: f32[32,128], index: 2, kind: input, shape index: {}]   ;;  %s1181_s3 = inlined_call_operand.vmem [shape: f32[32,128], index: 3, kind: input, shape index: {}]   ;;  %s1182_s4 = inlined_call_operand.vmem [shape: f32[1,128], index: 4, kind: input, shape index: {}]   ;;  %s1183_s5 = inlined_call_operand.vmem [shape: f32[128,128], index: 5, kind: input, shape index: {}]   ;;  %s1184_s6 = inlined_call_operand.vmem [shape: f32[1,128], index: 6, kind: input, shape index: {}]   ;;  %s1185_s7 = inlined_call_operand.vmem [shape: f32[288,128], index: 7, kind: output, shape index: {}]  }
   0x1 LB: > { %s798_s25 = sadd.s32 4294967295, %s1013_s24   ;;  %p802_p0 = scmp.ge.s32.totalorder %s1013_s24, 1  ;;  %s1013_s24 = sphi %s1055_s24, %s17_s24  }
   0x2   : > { %p249_p1 = scmp.lt.s32.totalorder %s1013_s24, 7 }
   0x4   : > { %p250_p2 = pnand %p802_p0, %p249_p1 }
   0x5   : > { %v320_v0 = vld [vmem:[%s1181_s3] sm:$0xff] (!%p250_p2)  ;;  %v321_v1 = vld [vmem:[%s1181_s3 + $0x8] sm:$0xff] (!%p250_p2)  ;;  %v322_v2 = vld [vmem:[%s1181_s3 + $0x10] sm:$0xff] (!%p250_p2)  ;;  %s286_s9 = smul.u32 (!%p250_p2), 6, %s798_s25  ;;  %vm324_vm0 = vcmask (!%p250_p2), 261120  }
   0x6   : > { %253 = sbr.rel (%p250_p2) target bundleno = 479 (0x1df), region = 48  ;;  %v945_v3 = vpack.c.bf16 (!%p250_p2), %v321_v1, %v320_v0  ;;  %v323_v4 = vld [vmem:[%s1181_s3 + $0x18] sm:$0xff] (!%p250_p2)  ;;  %v310_v6 = vld [vmem:[%s1180_s2] sm:$0xff] (!%p250_p2)  ;;  %v311_v7 = vld [vmem:[%s1180_s2 + $0x8] sm:$0xff] (!%p250_p2) }
   0x7   : > { %v949_v5 = vpack.c.bf16 (!%p250_p2), %v323_v4, %v322_v2  ;;  %p287_p3 = scmp.lt.s32.totalorder (!%p250_p2), %s286_s9, 35  ;;  %v570_v8 = vld [vmem:[%s1183_s5] sm:$0xff] (!%p250_p2)  ;;  %v571_v9 = vld [vmem:[%s1183_s5 + $0x8] sm:$0xff] (!%p250_p2)  ;;  %v572_v10 = vld [vmem:[%s1183_s5 + $0x10] sm:$0xff] (!%p250_p2)  ;;  %v953_v14 = vpack.c.bf16 (!%p250_p2), %v311_v7, %v310_v6 }
   0x8   : > { %946 = vmatprep.subr.bf16.mxu0 (!%p250_p2), %v945_v3  ;;  %v573_v11 = vld [vmem:[%s1183_s5 + $0x18] sm:$0xff] (!%p250_p2)  ;;  %v961_v12 = vpack.c.bf16 (!%p250_p2), %v571_v9, %v570_v8  ;;  %v312_v15 = vld [vmem:[%s1180_s2 + $0x10] sm:$0xff] (!%p250_p2)  ;;  %v574_v17 = vld [vmem:[%s1183_s5 + $0x20] sm:$0xff] (!%p250_p2) }
   0x9   : > { %948 = vmatpush3.bf16.msra.mxu0 (!%p250_p2), %v945_v3  ;;  %v965_v13 = vpack.c.bf16 (!%p250_p2), %v573_v11, %v572_v10  ;;  %v313_v16 = vld [vmem:[%s1180_s2 + $0x18] sm:$0xff] (!%p250_p2)  ;;  %v575_v18 = vld [vmem:[%s1183_s5 + $0x28] sm:$0xff] (!%p250_p2)  ;;  %v576_v24 = vld [vmem:[%s1183_s5 + $0x30] sm:$0xff] (!%p250_p2) }
   0xa   : > { %950 = vmatprep.subr.bf16.mxu0 (!%p250_p2), %v949_v5  ;;  %962 = vmatprep.subr.bf16.mxu1 (!%p250_p2), %v961_v12  ;;  %v957_v22 = vpack.c.bf16 (!%p250_p2), %v313_v16, %v312_v15  ;;  %v969_v23 = vpack.c.bf16 (!%p250_p2), %v575_v18, %v574_v17  ;;  %v577_v25 = vld [vmem:[%s1183_s5 + $0x38] sm:$0xff] (!%p250_p2)  ;;  %v578_v29 = vld [vmem:[%s1183_s5 + $0x40] sm:$0xff] (!%p250_p2)  ;;  %v579_v30 = vld [vmem:[%s1183_s5 + $0x48] sm:$0xff] (!%p250_p2) }
   0xb   : > { %964 = vmatpush3.bf16.msra.mxu1 (!%p250_p2), %v961_v12  ;;  %v973_v28 = vpack.c.bf16 (!%p250_p2), %v577_v25, %v576_v24  ;;  %v977_v32 = vpack.c.bf16 (!%p250_p2), %v579_v30, %v578_v29  ;;  %v580_v34 = vld [vmem:[%s1183_s5 + $0x50] sm:$0xff] (!%p250_p2)  ;;  %v581_v35 = vld [vmem:[%s1183_s5 + $0x58] sm:$0xff] (!%p250_p2)  ;;  %v582_v39 = vld [vmem:[%s1183_s5 + $0x60] sm:$0xff] (!%p250_p2) }
   0xc   : > { %966 = vmatprep.subr.bf16.mxu1 (!%p250_p2), %v965_v13  ;;  %v981_v37 = vpack.c.bf16 (!%p250_p2), %v581_v35, %v580_v34  ;;  %v583_v40 = vld [vmem:[%s1183_s5 + $0x68] sm:$0xff] (!%p250_p2)  ;;  %v584_v45 = vld [vmem:[%s1183_s5 + $0x70] sm:$0xff] (!%p250_p2)  ;;  %v585_v46 = vld [vmem:[%s1183_s5 + $0x78] sm:$0xff] (!%p250_p2) }
   0xd   : > { %s1187_s9 = smov (!%p287_p3, %s286_s9), 35  ;;  %952 = vmatpush3.bf16.msra.mxu0 %v949_v5  ;;  %v985_v42 = vpack.c.bf16 %v583_v40, %v582_v39  ;;  %v989_v47 = vpack.c.bf16 %v585_v46, %v584_v45  ;;  %v818_v48 = vld [vmem:[%s1182_s4] ss:$0 sm:$0xff] }
   0xe   : > { %s1096_s27 = sshll.u32 %s1187_s9, 3  ;;  %954 = vmatprep.subr.bf16.mxu0 %v953_v14  ;;  %v819_v3 = vld [vmem:[%s1184_s6] ss:$0 sm:$0xff] }
   0xf   : > { %s296_s9 = scalar_lea.vmem %s1179_s1, %s1096_s27  ;;  %968 = vmatpush3.bf16.msra.mxu1 %v965_v13  ;;  %s290_s25 = scalar_lea.vmem %s1178_s0, %s1096_s27 }
  0x10   : > { %v314_v19 = vld [vmem:[%s296_s9] sm:$0xff]  ;;  %v315_v20 = vld [vmem:[%s296_s9 + $0x8] sm:$0xff]  ;;  %v316_v21 = vld [vmem:[%s296_s9 + $0x10] sm:$0xff]  ;;  %970 = vmatprep.subr.bf16.mxu1 %v969_v23  ;;  %s1167_s22 = scalar_lea.vmem %s1185_s7, %s1096_s27 }
  0x11   : > { %878 = vmatprep.mubr.msk.f32.mxu0 %vm324_vm0, %v314_v19  ;;  %v317_v26 = vld [vmem:[%s296_s9 + $0x18] sm:$0xff]  ;;  %v318_v27 = vld [vmem:[%s296_s9 + $0x20] sm:$0xff]  ;;  %v319_v31 = vld [vmem:[%s296_s9 + $0x28] sm:$0xff] }
  0x12   : > { %879 = vmatmul.mubr.msk.f32.vlgmr.msra.gmra.mrb[0].mxu0 %vm324_vm0, %v315_v20  ;;  %v304_v33 = vld [vmem:[%s290_s25] sm:$0xff]  ;;  %v305_v36 = vld [vmem:[%s290_s25 + $0x8] sm:$0xff]  ;;  %v306_v38 = vld [vmem:[%s290_s25 + $0x10] sm:$0xff] }
  0x13   : > { %956 = vmatpush3.bf16.msra.mxu0 %v953_v14  ;;  %881 = vmatprep.mubr.msk.f32.mxu0 %vm324_vm0, %v316_v21  ;;  %v307_v41 = vld [vmem:[%s290_s25 + $0x18] sm:$0xff]  ;;  %v308_v43 = vld [vmem:[%s290_s25 + $0x20] sm:$0xff]  ;;  %v309_v44 = vld [vmem:[%s290_s25 + $0x28] sm:$0xff] }
  0x14   : > { %958 = vmatprep.subr.bf16.mxu0 %v957_v22  ;;  %972 = vmatpush3.bf16.msra.mxu1 %v969_v23 }
  0x15   : > { %974 = vmatprep.subr.bf16.mxu1 %v973_v28 }
  0x16   : > { %882 = vmatmul.mubr.msk.f32.gmra.mrb[2].mxu0 %vm324_vm0, %v317_v26 }
  0x17   : > { %884 = vmatprep.mubr.msk.f32.mxu0 %vm324_vm0, %v318_v27  ;;  %960 = vmatpush3.bf16.msra.mxu0 %v957_v22 }
  0x18   : > { %976 = vmatpush3.bf16.msra.mxu1 %v973_v28 }
  0x19   : > { %978 = vmatprep.subr.bf16.mxu1 %v977_v32 }
  0x1a   : > { %885 = vmatmul.mubr.msk.f32.gmra.mrb[4].mxu0 %vm324_vm0, %v319_v31 }
  0x1b   : > { %895 = vmatprep.mubr.msk.f32.mxu0 %vm324_vm0, %v304_v33 }
  0x1c   : > { %980 = vmatpush3.bf16.msra.mxu1 %v977_v32 }
  0x1d   : > { %982 = vmatprep.subr.bf16.mxu1 %v981_v37 }
  0x1e   : > { %896 = vmatmul.mubr.msk.f32.vlgmr.msra.gmra.mrb[0].mxu0 %vm324_vm0, %v305_v36 }
  0x1f   : > { %898 = vmatprep.mubr.msk.f32.mxu0 %vm324_vm0, %v306_v38 }
  0x20   : > { %984 = vmatpush3.bf16.msra.mxu1 %v981_v37 }
  0x21   : > { %986 = vmatprep.subr.bf16.mxu1 %v985_v42 }
  0x22   : > { %899 = vmatmul.mubr.msk.f32.gmra.mrb[2].mxu0 %vm324_vm0, %v307_v41 }
  0x23   : > { %901 = vmatprep.mubr.msk.f32.mxu0 %vm324_vm0, %v308_v43 }
  0x24   : > { %988 = vmatpush3.bf16.msra.mxu1 %v985_v42 }
  0x25   : > { %990 = vmatprep.subr.bf16.mxu1 %v989_v47 }
  0x26   : > { %902 = vmatmul.mubr.msk.f32.gmra.mrb[4].mxu0 %vm324_vm0, %v309_v44 }
  0x28   : > { %992 = vmatpush3.bf16.msra.mxu1 %v989_v47 }
  0xf1   : > { %v897_v49 = vpop.f32.mrb[0].mxu0 }
  0xf2   : > { %v559_v50 = vadd.f32 %v897_v49, %v818_v48  ;;  %v522_v51 = vpop.f32.mrb[1].mxu0 }
  0xf3   : > { %v558_v52 = vadd.f32 %v818_v48, %v522_v51 }
  0xf4   : > { %v565_v55 = vmax.f32 %v559_v50, 0.0 }
  0xf5   : > { %v900_v53 = vpop.f32.mrb[2].mxu0  ;;  %v564_v54 = vmax.f32 %v558_v52, 0.0 }
  0xf6   : > { %v561_v56 = vadd.f32 %v900_v53, %v818_v48  ;;  %v532_v57 = vpop.f32.mrb[3].mxu0 }
  0xf7   : > { %v560_v58 = vadd.f32 %v818_v48, %v532_v57  ;;  %936 = vmatprep.mubr.f32.mxu1 %v564_v54 }
  0xf8   : > { %937 = vmatmul.mubr.f32.vlgmr.msra.gmra.mrb[0].mxu1 %v565_v55  ;;  %v567_v61 = vmax.f32 %v561_v56, 0.0 }
  0xf9   : > { %v566_v59 = vmax.f32 %v560_v58, 0.0  ;;  %v903_v60 = vpop.f32.mrb[4].mxu0 }
  0xfa   : > { %v563_v62 = vadd.f32 %v903_v60, %v818_v48  ;;  %v542_v63 = vpop.f32.mrb[5].mxu0 }
  0xfb   : > { %v562_v0 = vadd.f32 %v818_v48, %v542_v63  ;;  %939 = vmatprep.mubr.f32.mxu1 %v566_v59 }
  0xfc   : > { %940 = vmatmul.mubr.f32.gmra.mrb[2].mxu1 %v567_v61  ;;  %v569_v2 = vmax.f32 %v563_v62, 0.0 }
  0xfd   : > { %v568_v1 = vmax.f32 %v562_v0, 0.0 }
  0xff   : > { %942 = vmatprep.mubr.f32.mxu1 %v568_v1 }
 0x100   : > { %943 = vmatmul.mubr.f32.gmra.mrb[4].mxu1 %v569_v2 }
 0x1cb   : > { %v938_v4 = vpop.f32.mrb[0].mxu1 }
 0x1cc   : > { %v665_v5 = vadd.f32 %v938_v4, %v819_v3  ;;  %v659_v6 = vpop.f32.mrb[1].mxu1 }
 0x1cd   : > { %v660_v7 = vadd.f32 %v819_v3, %v659_v6 }
 0x1ce   : > { %v821_v8 = vadd.f32 -0.01, %v665_v5  ;;  %vm701_vm1 = vcmp.lt.f32.partialorder %v665_v5, -0.01  ;;  %v707_v9 = vadd.f32 0.01, %v665_v5 }
 0x1cf   : > { %v820_v10 = vadd.f32 -0.01, %v660_v7  ;;  %vm700_vm2 = vcmp.lt.f32.partialorder %v660_v7, -0.01  ;;  %v706_v11 = vadd.f32 0.01, %v660_v7 }
 0x1d0   : > { %v941_v12 = vpop.f32.mrb[2].mxu1  ;;  %vm689_vm3 = vcmp.gt.f32.partialorder %v665_v5, 0.01  ;;  %v713_v13 = vsel %vm701_vm1, %v707_v9, 0.0  ;;  %vm688_vm4 = vcmp.gt.f32.partialorder %v660_v7, 0.01 }
 0x1d1   : > { %v675_v14 = vadd.f32 %v941_v12, %v819_v3  ;;  %v669_v15 = vpop.f32.mrb[3].mxu1  ;;  %v719_v16 = vsel %vm689_vm3, %v821_v8, %v713_v13  ;;  %v712_v17 = vsel %vm700_vm2, %v706_v11, 0.0 }
 0x1d2   : > { %v670_v18 = vadd.f32 %v819_v3, %v669_v15  ;;  %725 = vst [vmem:[%s1167_s22 + $0x8] sm:$0xff] %v719_v16  ;;  %v718_v19 = vsel %vm688_vm4, %v820_v10, %v712_v17 }
 0x1d3   : > { %v823_v20 = vadd.f32 -0.01, %v675_v14  ;;  %vm703_vm5 = vcmp.lt.f32.partialorder %v675_v14, -0.01  ;;  %724 = vst [vmem:[%s1167_s22] sm:$0xff] %v718_v19  ;;  %v709_v21 = vadd.f32 0.01, %v675_v14 }
 0x1d4   : > { %v822_v22 = vadd.f32 -0.01, %v670_v18  ;;  %vm702_vm6 = vcmp.lt.f32.partialorder %v670_v18, -0.01  ;;  %v708_v23 = vadd.f32 0.01, %v670_v18 }
 0x1d5   : > { %v944_v24 = vpop.f32.mrb[4].mxu1  ;;  %vm691_vm7 = vcmp.gt.f32.partialorder %v675_v14, 0.01  ;;  %v715_v25 = vsel %vm703_vm5, %v709_v21, 0.0  ;;  %vm690_vm8 = vcmp.gt.f32.partialorder %v670_v18, 0.01 }
 0x1d6   : > { %v685_v26 = vadd.f32 %v944_v24, %v819_v3  ;;  %v679_v27 = vpop.f32.mrb[5].mxu1  ;;  %v721_v28 = vsel %vm691_vm7, %v823_v20, %v715_v25  ;;  %v714_v29 = vsel %vm702_vm6, %v708_v23, 0.0 }
 0x1d7   : > { %v680_v30 = vadd.f32 %v819_v3, %v679_v27  ;;  %727 = vst [vmem:[%s1167_s22 + $0x18] sm:$0xff] %v721_v28  ;;  %v720_v31 = vsel %vm690_vm8, %v822_v22, %v714_v29 }
 0x1d8   : > { %v825_v32 = vadd.f32 -0.01, %v685_v26  ;;  %vm705_vm9 = vcmp.lt.f32.partialorder %v685_v26, -0.01  ;;  %726 = vst [vmem:[%s1167_s22 + $0x10] sm:$0xff] %v720_v31 }
 0x1d9   : > { %v711_v33 = vadd.f32 0.01, %v685_v26  ;;  %v824_v34 = vadd.f32 -0.01, %v680_v30  ;;  %vm704_vm10 = vcmp.lt.f32.partialorder %v680_v30, -0.01 }
 0x1da   : > { %v710_v35 = vadd.f32 0.01, %v680_v30  ;;  %vm693_vm11 = vcmp.gt.f32.partialorder %v685_v26, 0.01  ;;  %vm692_vm12 = vcmp.gt.f32.partialorder %v680_v30, 0.01 }
 0x1db   : > { %v717_v36 = vsel %vm705_vm9, %v711_v33, 0.0 }
 0x1dc   : > { %v723_v37 = vsel %vm693_vm11, %v825_v32, %v717_v36  ;;  %v716_v38 = vsel %vm704_vm10, %v710_v35, 0.0 }
 0x1dd   : > { %729 = vst [vmem:[%s1167_s22 + $0x28] sm:$0xff] %v723_v37  ;;  %v722_v39 = vsel %vm692_vm12, %v824_v34, %v716_v38 }
 0x1de   : > { %728 = vst [vmem:[%s1167_s22 + $0x20] sm:$0xff] %v722_v39 }
 0x1df PF: > { %s17_s24 = sadd.s32 1, %s1013_s24  }
 0x1e0   : > { %p14_p4 = scmp.ge.s32.totalorder %s17_s24, 8  }
 0x1e2   :  { %16 = sbr.rel (!%p14_p4) target bundleno = 1 (0x1), region = 81 }

</bundles_post_ra>
